<compile_context>
chip_gen: v6e
topology: v6e:2x2x1
jax: 0.10.0
libtpu: 0.0.40
codegen_flags: <defaults>
</compile_context>

<pallas_src>
import jax
import jax.numpy as jnp
from jax.experimental import pallas as pl
from jax.experimental.pallas import tpu as pltpu

D_IN = 32 * 32 * 3      # 3072
D_OUT = 10
D_PAD = 128             # lane-padded output width (avoids masked vst.msk stores)
DEFAULT_TB_MAX = 1024   # max batch tile (rows); ~15 MiB total VMEM at bf16


def affine_kernel(x_ref, w_ref, b_ref, o_ref):
    # Single fused affine map: [TB, 3072]bf16 @ [3072, 128]bf16 -> f32 acc, + bias.
    o_ref[...] = (jnp.dot(x_ref[...], w_ref[...],
                          preferred_element_type=jnp.float32)
                  + b_ref[...]).astype(o_ref.dtype)


def _round_up(n, m):
    return ((n + m - 1) // m) * m


def collapse_params(params):
    """Fold the activation-free 3-layer chain into one affine map (W, b).

    Returns W: [3072, 128] bf16 (zero lane-padded from 10 cols), b: [1, 128] f32.
    The collapse itself is done in f32; only the streamed W is cast to bf16.
    """
    w1, b1, w2, b2, w3, b3 = params
    w = (w1 @ w2) @ w3                      # [3072, 10], f32
    b = (b1 @ w2 + b2) @ w3 + b3            # [1, 10],    f32
    w_pad = jnp.pad(w, ((0, 0), (0, D_PAD - D_OUT))).astype(jnp.bfloat16)
    b_pad = jnp.pad(b, ((0, 0), (0, D_PAD - D_OUT)))   # bias stays f32
    return w_pad, b_pad


def _choose_tb(B, tb_max):
    """Batch tile: multiple of 16 (bf16 sublanes), <= tb_max, and sized so the
    grid has >= 2 steps when B allows it (keeps both v7x TensorCores busy under
    dimension_semantics=('parallel',))."""
    half = _round_up(max(1, (B + 1) // 2), 16)
    tb = min(tb_max, _round_up(B, 16), half)
    return max(16, tb)


def boringnet4_forward(x, params, tb_max=DEFAULT_TB_MAX):
    """x: [B, 3, 32, 32] float32 (NCHW). Returns [B, 10] float32."""
    B = x.shape[0]
    # torch .view(-1, 3072) is a plain row-major reshape; bf16 cast halves the
    # HBM bytes streamed by the kernel for the dominant operand.
    x_flat = jnp.reshape(x, (B, D_IN)).astype(jnp.bfloat16)

    w, b = collapse_params(params)

    TB = _choose_tb(B, tb_max)
    n_tiles = pl.cdiv(B, TB)   # ragged last tile; no jnp.pad copy of x

    cost = pl.CostEstimate(
        flops=2 * B * D_IN * D_PAD,
        transcendentals=0,
        bytes_accessed=(B * D_IN * 2          # x, bf16 (streamed)
                        + D_IN * D_PAD * 2    # W, bf16 (resident)
                        + D_PAD * 4           # bias, f32
                        + B * D_PAD * 4),     # out, f32
    )

    const = lambda i: (0, 0)  # W/b: same block every step -> DMA'd once, resident

    out = pl.pallas_call(
        affine_kernel,
        out_shape=jax.ShapeDtypeStruct((B, D_PAD), jnp.float32),
        grid_spec=pltpu.PrefetchScalarGridSpec(
            num_scalar_prefetch=0,
            grid=(n_tiles,),
            in_specs=[
                pl.BlockSpec((TB, D_IN), lambda i: (i, 0)),   # x: streamed per tile
                pl.BlockSpec((D_IN, D_PAD), const),           # collapsed W
                pl.BlockSpec((1, D_PAD), const),              # collapsed bias
            ],
            out_specs=pl.BlockSpec((TB, D_PAD), lambda i: (i, 0)),
        ),
        compiler_params=pltpu.CompilerParams(
            dimension_semantics=("parallel",),     # megacore sharding on v7x
            vmem_limit_bytes=32 * 1024 * 1024,     # ~15 MiB actually used at TB=1024
        ),
        cost_estimate=cost,
    )(x_flat, w, b)

    return out[:, :D_OUT]


def init_params(key):
    """Deterministic init mimicking nn.Linear default (U[-1/sqrt(fan_in), +...]).

    Weights are stored transposed relative to PyTorch: [in_features, out_features].
    Biases are stored as [1, out_features].
    """
    dims = [(D_IN, 120), (120, 84), (84, 10)]
    params = []
    for i, (fan_in, fan_out) in enumerate(dims):
        kw, kb = jax.random.split(jax.random.fold_in(key, i))
        bound = 1.0 / (fan_in ** 0.5)
        w = jax.random.uniform(kw, (fan_in, fan_out), jnp.float32,
                               minval=-bound, maxval=bound)
        b = jax.random.uniform(kb, (1, fan_out), jnp.float32,
                               minval=-bound, maxval=bound)
        params += [w, b]
    return tuple(params)


if __name__ == "__main__":
    key = jax.random.PRNGKey(0)
    k_x, k_p = jax.random.split(key)

    B = 2
    x = jax.random.normal(k_x, (B, 3, 32, 32), jnp.float32)
    params = init_params(k_p)

    out = boringnet4_forward(x, params)
    jax.block_until_ready(out)

    # Pure-f32 reference of the same 3-layer forward (looser tol: bf16 inputs
    # + collapsed-weight associativity change rounding slightly).
    w1, b1, w2, b2, w3, b3 = params
    ref = jnp.reshape(x, (B, -1)) @ w1 + b1
    ref = ref @ w2 + b2
    ref = ref @ w3 + b3

    assert out.shape == (B, 10)
    assert jnp.allclose(out, ref, atol=2e-2, rtol=2e-2)

    print("KERNEL_OK")
</pallas_src>

<mosaic_0001>
module attributes {stable_mosaic.version = 11 : i64} {
  func.func @affine_kernel(%arg0: i32, %arg1: memref<16x3072xbf16, #tpu.memory_space<vmem>>, %arg2: memref<3072x128xbf16, #tpu.memory_space<vmem>>, %arg3: memref<1x128xf32, #tpu.memory_space<vmem>>, %arg4: memref<16x128xf32, #tpu.memory_space<vmem>>) attributes {dimension_semantics = [#tpu.dimension_semantics<parallel>], iteration_bounds = array<i64: 1>, scalar_prefetch = 0 : i64, scratch_operands = 0 : i64, tpu.core_type = #tpu.core_type<tc>, window_params = [{transform_indices = @transform_0, window_bounds = array<i64: 16, 3072>}, {pipeline_mode = #tpu.pipeline_mode<synchronous>, transform_indices = @transform_1, window_bounds = array<i64: 3072, 128>}, {pipeline_mode = #tpu.pipeline_mode<synchronous>, transform_indices = @transform_2, window_bounds = array<i64: 1, 128>}, {transform_indices = @transform_3, window_bounds = array<i64: 16, 128>}]} {
    %c0 = arith.constant 0 : index
    %c0_0 = arith.constant 0 : index
    %0 = vector.load %arg1[%c0, %c0_0] : memref<16x3072xbf16, #tpu.memory_space<vmem>>, vector<16x3072xbf16>
    %c0_1 = arith.constant 0 : index
    %c0_2 = arith.constant 0 : index
    %1 = vector.load %arg2[%c0_1, %c0_2] : memref<3072x128xbf16, #tpu.memory_space<vmem>>, vector<3072x128xbf16>
    %cst = arith.constant dense<0.000000e+00> : vector<16x128xf32>
    %2 = tpu.matmul %0, %1, %cst {dimension_numbers = #tpu.dot_dimension_numbers<[1], [0], [0], [1], [0, 0, 1, 1], [], []>} : vector<16x3072xbf16>, vector<3072x128xbf16>, vector<16x128xf32> -> vector<16x128xf32>
    %c0_3 = arith.constant 0 : index
    %c0_4 = arith.constant 0 : index
    %3 = vector.load %arg3[%c0_3, %c0_4] : memref<1x128xf32, #tpu.memory_space<vmem>>, vector<1x128xf32>
    %4 = vector.broadcast %3 : vector<1x128xf32> to vector<16x128xf32>
    %5 = arith.addf %2, %4 : vector<16x128xf32>
    %c0_5 = arith.constant 0 : index
    %c0_6 = arith.constant 0 : index
    %6 = vector.load %arg4[%c0_5, %c0_6] : memref<16x128xf32, #tpu.memory_space<vmem>>, vector<16x128xf32>
    tpu.vector_store %arg4[%c0_5, %c0_6], %5 {strides = array<i32>} : memref<16x128xf32, #tpu.memory_space<vmem>>, vector<16x128xf32>,
    return
  }
  func.func @transform_0(%arg0: i32) -> (i32, i32) {
    %c0_i32 = arith.constant 0 : i32
    %c0_i32_0 = arith.constant 0 : i32
    return %arg0, %c0_i32 : i32, i32
  }
  func.func @transform_1(%arg0: i32) -> (i32, i32) {
    %c0_i32 = arith.constant 0 : i32
    %c0_i32_0 = arith.constant 0 : i32
    %c0_i32_1 = arith.constant 0 : i32
    return %c0_i32, %c0_i32_0 : i32, i32
  }
  func.func @transform_2(%arg0: i32) -> (i32, i32) {
    %c0_i32 = arith.constant 0 : i32
    %c0_i32_0 = arith.constant 0 : i32
    %c0_i32_1 = arith.constant 0 : i32
    return %c0_i32, %c0_i32_0 : i32, i32
  }
  func.func @transform_3(%arg0: i32) -> (i32, i32) {
    %c0_i32 = arith.constant 0 : i32
    %c0_i32_0 = arith.constant 0 : i32
    return %arg0, %c0_i32 : i32, i32
  }
}

</mosaic_0001>

<bundles_post_ra>
// kernel: tpu_custom_call.1
= control target key start
LH: loop header
LB: loop body
LE: loop exit
PB: predicated region body
PF: predicated region fallthrough
CT: control target
= control target key end

     0   :  { %8 = vsyncpa [#allocation3], 0  ;;  %s3448_s0 = inlined_call_operand.hbm [shape: bf16[2,3072], index: 0, kind: input, shape index: {}]   ;;  %s3449_s1 = inlined_call_operand.hbm [shape: bf16[3072,128], index: 1, kind: input, shape index: {}]   ;;  %s3450_s2 = inlined_call_operand.vmem [shape: f32[1,128], index: 2, kind: input, shape index: {}]   ;;  %s3451_s3 = inlined_call_operand.hbm [shape: f32[2,128], index: 3, kind: output, shape index: {}]  }
   0x1   :  { %9 = vsyncpa [#allocation6], 0 }
   0x2   :  { %10 = vsyncpa [#allocation4], 0 }
   0x3   :  { %15 = vsyncadd [#allocation3], 2688  ;;  %s3340_s12 = smov [#allocation2]  }
   0x4   :  { %s16_s13 = sshll.u32 %s3340_s12, 4  ;;  %s17_s13 = int_to_ptr.vmem [resolvable:$true] %s16_s13 }
   0x5   :  { %s3282_s14 = scalar_lea.vmem %s17_s13, 384  ;;  %s3286_s15 = scalar_lea.vmem %s17_s13, 3072 }
   0x6   :  { %p3283_p0 = scmp.ne.s32.totalorder %s17_s13, %s3282_s14  ;;  %p3287_p1 = scmp.lt.s32.totalorder %s17_s13, %s17_s13 }
   0x7   :  { %p3288_p2 = scmp.lt.s32.totalorder %s3286_s15, %s3282_s14 }
   0x9   :  { %p3289_p3 = por %p3288_p2, %p3287_p1 }
   0xb   :  { %p3290_p4 = pnand %p3289_p3, %p3283_p0 }
   0xd   :  { %3293 = shalt.err (!%p3290_p4)
}
   0xe   :  { %s3341_s16 = smov 384   ;;  %s3342_s17 = smov 24  }
   0xf   :  { %22 = dma.hbm_to_vmem [thread:$0]  %s3448_s0, 384, %s17_s13, [#allocation3], %s3341_s16, %s3341_s16, %s3342_s17  }
  0x10   :  { %s3343_s20 = smov [#allocation5]  }
  0x11   :  { %s28_s21 = sshll.u32 %s3343_s20, 4  ;;  %s29_s21 = int_to_ptr.vmem [resolvable:$true] %s28_s21 }
  0x12   :  { %s3302_s22 = scalar_lea.vmem %s29_s21, 24576  ;;  %p3307_p6 = scmp.lt.s32.totalorder %s29_s21, %s29_s21 }
  0x13   :  { %p3303_p5 = scmp.ne.s32.totalorder %s29_s21, %s3302_s22  ;;  %p3308_p7 = scmp.lt.s32.totalorder %s3302_s22, %s3302_s22 }
  0x15   :  { %p3309_p8 = por %p3308_p7, %p3307_p6 }
  0x17   :  { %p3310_p9 = pnand %p3309_p8, %p3303_p5 }
  0x19   :  { %3313 = shalt.err (!%p3310_p9)
}
  0x1a   :  { %s3344_s23 = smov 64   ;;  %s3345_s24 = smov 4  }
  0x1b   :  { %34 = dma.hbm_to_vmem [thread:$0]  %s3449_s1, 24576, %s29_s21, [#allocation6], %s3344_s23, %s3344_s23, %s3345_s24  }
  0x1c   :  { %3334 = dma.done.wait [#allocation3], 3072  }
  0x1d   :  { %3335 = vsyncadd [#allocation3], 4294964224 }
  0x1e   :  { %3336 = dma.done.wait [#allocation6], 24576  }
  0x1f   :  { %3337 = vsyncadd [#allocation6], 4294942720  ;;  %v3046_v0 = vld [vmem:[#allocation5 + $0x78] sm:$0xff]   ;;  %v3050_v4 = vld [vmem:[#allocation5 + $0x70] sm:$0xff]   ;;  %v3346_v25 = vmov 1966171168   ;;  %v494_v27 = vlaneseq }
  0x20   :  { %v3047_v1 = vld [vmem:[#allocation5 + $0xf8] sm:$0xff]   ;;  %2772 = vmatprep.subr.bf16.mxu0 %v3046_v0  ;;  %v3051_v5 = vld [vmem:[#allocation5 + $0xf0] sm:$0xff]   ;;  %v3054_v8 = vld [vmem:[#allocation5 + $0x68] sm:$0xff]   ;;  %v492_v26 = vunpack.c.l.s4 %v3346_v25 }
  0x21   :  { %v3048_v2 = vld [vmem:[#allocation5 + $0x38] sm:$0xff]   ;;  %2794 = vmatprep.subr.bf16.mxu1 %v3047_v1  ;;  %v3052_v6 = vld [vmem:[#allocation5 + $0x30] sm:$0xff]   ;;  %v3055_v9 = vld [vmem:[#allocation5 + $0xe8] sm:$0xff]   ;;  %v495_v33 = vshrl.u32 %v494_v27, 7 }
  0x22   :  { %v3049_v3 = vld [vmem:[#allocation5 + $0xb8] sm:$0xff]   ;;  %2773 = vmatpush3.bf16.msra.mxu0 %v3048_v2  ;;  %v3053_v7 = vld [vmem:[#allocation5 + $0xb0] sm:$0xff]   ;;  %v3056_v10 = vld [vmem:[#allocation5 + $0x28] sm:$0xff]   ;;  %v493_v32 = vunpack.c.0.s8 %v492_v26 }
  0x23   :  { %2795 = vmatpush3.bf16.msra.mxu1 %v3049_v3  ;;  %2774 = vmatprep.subr.bf16.mxu0 %v3050_v4  ;;  %v3057_v11 = vld [vmem:[#allocation5 + $0xa8] sm:$0xff]   ;;  %v3058_v12 = vld [vmem:[#allocation5 + $0x60] sm:$0xff]   ;;  %v3062_v16 = vld [vmem:[#allocation5 + $0x58] sm:$0xff]  }
  0x24   :  { %2796 = vmatprep.subr.bf16.mxu1 %v3051_v5  ;;  %v3059_v13 = vld [vmem:[#allocation5 + $0xe0] sm:$0xff]   ;;  %v3063_v17 = vld [vmem:[#allocation5 + $0xd8] sm:$0xff]   ;;  %v3066_v20 = vld [vmem:[#allocation5 + $0x50] sm:$0xff]   ;;  %v3376_v37 = vsub.s32 %v493_v32, %v495_v33 }
  0x25   :  { %v3060_v14 = vld [vmem:[#allocation5 + $0x20] sm:$0xff]   ;;  %v3064_v18 = vld [vmem:[#allocation5 + $0x18] sm:$0xff]   ;;  %v3067_v21 = vld [vmem:[#allocation5 + $0xd0] sm:$0xff]  }
  0x26   :  { %2775 = vmatpush3.bf16.msra.mxu0 %v3052_v6  ;;  %v3061_v15 = vld [vmem:[#allocation5 + $0xa0] sm:$0xff]   ;;  %v3065_v19 = vld [vmem:[#allocation5 + $0x98] sm:$0xff]   ;;  %v3068_v22 = vld [vmem:[#allocation5 + $0x10] sm:$0xff]  }
  0x27   :  { %2797 = vmatpush3.bf16.msra.mxu1 %v3053_v7  ;;  %2776 = vmatprep.subr.bf16.mxu0 %v3054_v8  ;;  %v3069_v23 = vld [vmem:[#allocation5 + $0x90] sm:$0xff]   ;;  %v3070_v24 = vld [vmem:[#allocation5 + $0x48] sm:$0xff]   ;;  %v3074_v31 = vld [vmem:[#allocation5 + $0x40] sm:$0xff]  }
  0x28   :  { %2798 = vmatprep.subr.bf16.mxu1 %v3055_v9  ;;  %v3071_v28 = vld [vmem:[#allocation5 + $0xc8] sm:$0xff]   ;;  %v3075_v34 = vld [vmem:[#allocation5 + $0xc0] sm:$0xff]   ;;  %v3090_v52 = vld [vmem:[#allocation5 + $0x178] sm:$0xff]  }
  0x29   :  { %v3072_v29 = vld [vmem:[#allocation5 + $0x8] sm:$0xff]   ;;  %v3076_v35 = vld [vmem:[#allocation5] sm:$0xff]   ;;  %v3091_v56 = vld [vmem:[#allocation5 + $0x1f8] sm:$0xff]  }
  0x2a   :  { %2777 = vmatpush3.bf16.msra.mxu0 %v3056_v10  ;;  %v3073_v30 = vld [vmem:[#allocation5 + $0x88] sm:$0xff]   ;;  %v3077_v36 = vld [vmem:[#allocation5 + $0x80] sm:$0xff]   ;;  %v3092_v2 = vld [vmem:[#allocation5 + $0x138] sm:$0xff]  }
  0x2b   :  { %2799 = vmatpush3.bf16.msra.mxu1 %v3057_v11  ;;  %2778 = vmatprep.subr.bf16.mxu0 %v3058_v12  ;;  %v3078_v38 = vld [vmem:[#allocation2] ss:$24 sps:$4 sm:$0xff]   ;;  %v3080_v39 = vld [vmem:[#allocation2 + $0x4] ss:$24 sps:$4 sm:$0xff]   ;;  %v3081_v40 = vld [vmem:[#allocation2 + $0x30] ss:$24 sps:$4 sm:$0xff]  }
  0x2c   :  { %2800 = vmatprep.subr.bf16.mxu1 %v3059_v13  ;;  %v3083_v41 = vld [vmem:[#allocation2 + $0x34] ss:$24 sps:$4 sm:$0xff]   ;;  %v3084_v42 = vld [vmem:[#allocation2 + $0x60] ss:$24 sps:$4 sm:$0xff]   ;;  %v3086_v43 = vld [vmem:[#allocation2 + $0x64] ss:$24 sps:$4 sm:$0xff]   ;;  %v497_v45 = vrot.slane %v3078_v38, %v3376_v37  ;;  %v511_v47 = vrot.slane %v3081_v40, %v3376_v37  ;;  %v3381_v48 = vrot.slane %v3080_v39, %v3376_v37 }
  0x2d   :  { %v3087_v44 = vld [vmem:[#allocation2 + $0x90] ss:$24 sps:$4 sm:$0xff]   ;;  %v3089_v46 = vld [vmem:[#allocation2 + $0x94] ss:$24 sps:$4 sm:$0xff]   ;;  %v3384_v49 = vrot.slane %v3083_v41, %v3376_v37  ;;  %v525_v50 = vrot.slane %v3084_v42, %v3376_v37  ;;  %v3389_v53 = vrot.slane %v3086_v43, %v3376_v37  ;;  %v3093_v4 = vld [vmem:[#allocation5 + $0x1b8] sm:$0xff]  }
  0x2e   :  { %2779 = vmatpush3.bf16.msra.mxu0 %v3060_v14  ;;  %v539_v51 = vrot.slane %v3087_v44, %v3376_v37  ;;  %v548_v54 = vcombine.high %v497_v45, %v511_v47  ;;  %v547_v55 = vcombine.low %v497_v45, %v511_v47  ;;  %v3392_v57 = vrot.slane %v3089_v46, %v3376_v37  ;;  %v3094_v10 = vld [vmem:[#allocation5 + $0x170] sm:$0xff]   ;;  %v3107_v25 = vld [vmem:[#allocation5 + $0x1d8] sm:$0xff]   ;;  %v3114_v32 = vld [vmem:[#allocation5 + $0x148] sm:$0xff]  }
  0x2f   :  { %2801 = vmatpush3.bf16.msra.mxu1 %v3061_v15  ;;  %2780 = vmatprep.subr.bf16.mxu0 %v3062_v16  ;;  %v550_v58 = vcombine.high %v3381_v48, %v3384_v49  ;;  %v3095_v11 = vld [vmem:[#allocation5 + $0x1f0] sm:$0xff]   ;;  %v3098_v16 = vld [vmem:[#allocation5 + $0x168] sm:$0xff]   ;;  %v3108_v26 = vld [vmem:[#allocation5 + $0x118] sm:$0xff]  }
  0x30   :  { %2802 = vmatprep.subr.bf16.mxu1 %v3063_v17  ;;  %v552_v59 = vcombine.high %v525_v50, %v539_v51  ;;  %v551_v60 = vcombine.low %v525_v50, %v539_v51  ;;  %v575_v61 = vrot.slane %v548_v54, %v3376_v37  ;;  %v561_v62 = vrot.slane %v547_v55, %v3376_v37  ;;  %v3096_v12 = vld [vmem:[#allocation5 + $0x130] sm:$0xff]   ;;  %v3099_v17 = vld [vmem:[#allocation5 + $0x1e8] sm:$0xff]   ;;  %v3109_v27 = vld [vmem:[#allocation5 + $0x198] sm:$0xff]  }
  0x31   :  { %v554_v63 = vcombine.high %v3389_v53, %v3392_v57  ;;  %v582_v3 = vrot.slane %v550_v58, %v3376_v37  ;;  %v3097_v15 = vld [vmem:[#allocation5 + $0x1b0] sm:$0xff]   ;;  %v3115_v33 = vld [vmem:[#allocation5 + $0x1c8] sm:$0xff]   ;;  %v553_v38 = vcombine.low %v3389_v53, %v3392_v57  ;;  %v3118_v39 = vld [vmem:[#allocation5 + $0x140] sm:$0xff]  }
  0x32   :  { %2781 = vmatpush3.bf16.msra.mxu0 %v3064_v18  ;;  %v603_v0 = vrot.slane %v552_v59, %v3376_v37  ;;  %v589_v1 = vrot.slane %v551_v60, %v3376_v37  ;;  %v3100_v18 = vld [vmem:[#allocation5 + $0x128] sm:$0xff]   ;;  %v3119_v40 = vld [vmem:[#allocation5 + $0x1c0] sm:$0xff]   ;;  %v3122_v45 = vld [vmem:[#allocation5 + $0x278] sm:$0xff]  }
  0x33   :  { %2803 = vmatpush3.bf16.msra.mxu1 %v3065_v19  ;;  %2782 = vmatprep.subr.bf16.mxu0 %v3066_v20  ;;  %v610_v5 = vrot.slane %v554_v63, %v3376_v37  ;;  %v3101_v19 = vld [vmem:[#allocation5 + $0x1a8] sm:$0xff]   ;;  %v3102_v20 = vld [vmem:[#allocation5 + $0x160] sm:$0xff]   ;;  %v596_v44 = vrot.slane %v553_v38, %v3376_v37  ;;  %v3123_v46 = vld [vmem:[#allocation5 + $0x2f8] sm:$0xff]  }
  0x34   :  { %2804 = vmatprep.subr.bf16.mxu1 %v3067_v21  ;;  %v615_v6 = vcombine.low %v575_v61, %v603_v0  ;;  %v616_v7 = vcombine.high %v575_v61, %v603_v0  ;;  %v611_v8 = vcombine.low %v561_v62, %v589_v1  ;;  %v612_v9 = vcombine.high %v561_v62, %v589_v1  ;;  %v3103_v21 = vld [vmem:[#allocation5 + $0x1e0] sm:$0xff]   ;;  %v3124_v47 = vld [vmem:[#allocation5 + $0x238] sm:$0xff]   ;;  %v3126_v51 = vld [vmem:[#allocation5 + $0x270] sm:$0xff]  }
  0x35   :  { %v617_v13 = vcombine.low %v582_v3, %v610_v5  ;;  %v618_v14 = vcombine.high %v582_v3, %v610_v5  ;;  %v3120_v41 = vld [vmem:[#allocation5 + $0x100] sm:$0xff]   ;;  %v3125_v50 = vld [vmem:[#allocation5 + $0x2b8] sm:$0xff]   ;;  %v3128_v53 = vld [vmem:[#allocation5 + $0x230] sm:$0xff]  }
  0x36   :  { %2783 = vmatpush3.bf16.msra.mxu0 %v3068_v22  ;;  %2099 = vmatprep.mubr.bf16.mxu0 %v615_v6  ;;  %v3104_v22 = vld [vmem:[#allocation5 + $0x120] sm:$0xff]   ;;  %v3129_v54 = vld [vmem:[#allocation5 + $0x2b0] sm:$0xff]   ;;  %v3130_v55 = vld [vmem:[#allocation5 + $0x268] sm:$0xff]  }
  0x37   :  { %2805 = vmatpush3.bf16.msra.mxu1 %v3069_v23  ;;  %2784 = vmatprep.subr.bf16.mxu0 %v3070_v24  ;;  %v3105_v23 = vld [vmem:[#allocation5 + $0x1a0] sm:$0xff]   ;;  %v3106_v24 = vld [vmem:[#allocation5 + $0x158] sm:$0xff]   ;;  %v3132_v57 = vld [vmem:[#allocation5 + $0x228] sm:$0xff]  }
  0x38   :  { %2806 = vmatprep.subr.bf16.mxu1 %v3071_v28  ;;  %2140 = vmatprep.mubr.bf16.mxu1 %v616_v7  ;;  %v3110_v28 = vld [vmem:[#allocation5 + $0x150] sm:$0xff]   ;;  %v3121_v42 = vld [vmem:[#allocation5 + $0x180] sm:$0xff]   ;;  %v3133_v58 = vld [vmem:[#allocation5 + $0x2a8] sm:$0xff]  }
  0x39   :  { %v3134_v59 = vld [vmem:[#allocation5 + $0x260] sm:$0xff]   ;;  %v3138_v63 = vld [vmem:[#allocation5 + $0x258] sm:$0xff]   ;;  %v3142_v3 = vld [vmem:[#allocation5 + $0x250] sm:$0xff]  }
  0x3a   :  { %2785 = vmatpush3.bf16.msra.mxu0 %v3072_v29  ;;  %v3111_v29 = vld [vmem:[#allocation5 + $0x1d0] sm:$0xff]   ;;  %v3135_v60 = vld [vmem:[#allocation5 + $0x2e0] sm:$0xff]   ;;  %v3139_v0 = vld [vmem:[#allocation5 + $0x2d8] sm:$0xff]  }
  0x3b   :  { %2807 = vmatpush3.bf16.msra.mxu1 %v3073_v30  ;;  %2786 = vmatprep.subr.bf16.mxu0 %v3074_v31  ;;  %v3112_v30 = vld [vmem:[#allocation5 + $0x110] sm:$0xff]   ;;  %v3136_v61 = vld [vmem:[#allocation5 + $0x220] sm:$0xff]   ;;  %v3140_v1 = vld [vmem:[#allocation5 + $0x218] sm:$0xff]  }
  0x3c   :  { %2808 = vmatprep.subr.bf16.mxu1 %v3075_v34  ;;  %v3113_v31 = vld [vmem:[#allocation5 + $0x190] sm:$0xff]   ;;  %v3116_v34 = vld [vmem:[#allocation5 + $0x108] sm:$0xff]   ;;  %v3137_v62 = vld [vmem:[#allocation5 + $0x2a0] sm:$0xff]  }
  0x3d   :  { %v3144_v5 = vld [vmem:[#allocation5 + $0x210] sm:$0xff]   ;;  %v3146_v7 = vld [vmem:[#allocation5 + $0x248] sm:$0xff]  }
  0x3e   :  { %2787 = vmatpush3.bf16.msra.mxu0 %v3076_v35  ;;  %v3117_v35 = vld [vmem:[#allocation5 + $0x188] sm:$0xff]   ;;  %v3145_v6 = vld [vmem:[#allocation5 + $0x290] sm:$0xff]  }
  0x3f   :  { %2809 = vmatpush3.bf16.msra.mxu1 %v3077_v36  ;;  %2816 = vmatprep.subr.bf16.mxu0 %v3090_v52  ;;  %v549_v36 = vcombine.low %v3381_v48, %v3384_v49  ;;  %v3127_v52 = vld [vmem:[#allocation5 + $0x2f0] sm:$0xff]  }
  0x40   :  { %2838 = vmatprep.subr.bf16.mxu1 %v3091_v56  ;;  %v3131_v56 = vld [vmem:[#allocation5 + $0x2e8] sm:$0xff]  }
  0x41   :  { %2100 = vmatmul.mubr.bf16.vlgmr.msra.gmra.mxu0 %v611_v8  ;;  %v568_v43 = vrot.slane %v549_v36, %v3376_v37  ;;  %v3147_v8 = vld [vmem:[#allocation5 + $0x2c8] sm:$0xff]  }
  0x42   :  { %2141 = vmatmul.mubr.bf16.vlgmr.msra.gmra.mxu1 %v612_v9  ;;  %2817 = vmatpush3.bf16.msra.mxu0 %v3092_v2  ;;  %v3141_v2 = vld [vmem:[#allocation5 + $0x298] sm:$0xff]   ;;  %v3148_v9 = vld [vmem:[#allocation5 + $0x208] sm:$0xff]  }
  0x43   :  { %2839 = vmatpush3.bf16.msra.mxu1 %v3093_v4  ;;  %2818 = vmatprep.subr.bf16.mxu0 %v3094_v10  ;;  %v613_v48 = vcombine.low %v568_v43, %v596_v44  ;;  %v614_v49 = vcombine.high %v568_v43, %v596_v44  ;;  %v3143_v4 = vld [vmem:[#allocation5 + $0x2d0] sm:$0xff]   ;;  %v3149_v10 = vld [vmem:[#allocation5 + $0x288] sm:$0xff]  }
  0x44   :  { %2840 = vmatprep.subr.bf16.mxu1 %v3095_v11  ;;  %2181 = vmatprep.mubr.bf16.mxu0 %v617_v13  ;;  %v3150_v11 = vld [vmem:[#allocation5 + $0x240] sm:$0xff]   ;;  %v3169_v43 = vld [vmem:[#allocation5 + $0x3b0] sm:$0xff]   ;;  %v3170_v44 = vld [vmem:[#allocation5 + $0x368] sm:$0xff]  }
  0x45   :  { %2222 = vmatprep.mubr.bf16.mxu1 %v618_v14  ;;  %v3152_v13 = vld [vmem:[#allocation5 + $0x200] sm:$0xff]  }
  0x46   :  { %2819 = vmatpush3.bf16.msra.mxu0 %v3096_v12  ;;  %v3151_v12 = vld [vmem:[#allocation5 + $0x2c0] sm:$0xff]  }
  0x47   :  { %2841 = vmatpush3.bf16.msra.mxu1 %v3097_v15  ;;  %2820 = vmatprep.subr.bf16.mxu0 %v3098_v16  ;;  %v3153_v14 = vld [vmem:[#allocation5 + $0x280] sm:$0xff]   ;;  %v3156_v16 = vld [vmem:[#allocation2 + $0x38] ss:$24 sps:$4 sm:$0xff]  }
  0x48   :  { %2842 = vmatprep.subr.bf16.mxu1 %v3099_v17  ;;  %v3154_v15 = vld [vmem:[#allocation2 + $0x8] ss:$24 sps:$4 sm:$0xff]  }
  0x49   :  { %v3158_v17 = vld [vmem:[#allocation2 + $0x68] ss:$24 sps:$4 sm:$0xff]  }
  0x4a   :  { %2821 = vmatpush3.bf16.msra.mxu0 %v3100_v18  ;;  %v3160_v18 = vld [vmem:[#allocation2 + $0x98] ss:$24 sps:$4 sm:$0xff]  }
  0x4b   :  { %2843 = vmatpush3.bf16.msra.mxu1 %v3101_v19  ;;  %2822 = vmatprep.subr.bf16.mxu0 %v3102_v20  ;;  %v633_v19 = vrot.slane %v3154_v15, %v3376_v37  ;;  %v647_v20 = vrot.slane %v3156_v16, %v3376_v37  ;;  %v3198_v16 = vld [vmem:[#allocation5 + $0x478] sm:$0xff]  }
  0x4c   :  { %2844 = vmatprep.subr.bf16.mxu1 %v3103_v21  ;;  %v661_v21 = vrot.slane %v3158_v17, %v3376_v37 }
  0x4e   :  { %2823 = vmatpush3.bf16.msra.mxu0 %v3104_v22  ;;  %v3162_v22 = vld [vmem:[#allocation5 + $0x378] sm:$0xff]  }
  0x4f   :  { %2845 = vmatpush3.bf16.msra.mxu1 %v3105_v23  ;;  %2824 = vmatprep.subr.bf16.mxu0 %v3106_v24  ;;  %v675_v23 = vrot.slane %v3160_v18, %v3376_v37  ;;  %v3163_v24 = vld [vmem:[#allocation5 + $0x3f8] sm:$0xff]  }
  0x50   :  { %2846 = vmatprep.subr.bf16.mxu1 %v3107_v25  ;;  %v684_v25 = vcombine.high %v633_v19, %v647_v20 }
  0x52   :  { %2825 = vmatpush3.bf16.msra.mxu0 %v3108_v26  ;;  %v683_v26 = vcombine.low %v633_v19, %v647_v20  ;;  %v3199_v19 = vld [vmem:[#allocation5 + $0x4f8] sm:$0xff]  }
  0x53   :  { %2847 = vmatpush3.bf16.msra.mxu1 %v3109_v27  ;;  %2826 = vmatprep.subr.bf16.mxu0 %v3110_v28  ;;  %v688_v27 = vcombine.high %v661_v21, %v675_v23  ;;  %v687_v28 = vcombine.low %v661_v21, %v675_v23  ;;  %v3201_v23 = vld [vmem:[#allocation5 + $0x4b8] sm:$0xff]  }
  0x54   :  { %2848 = vmatprep.subr.bf16.mxu1 %v3111_v29  ;;  %v711_v29 = vrot.slane %v684_v25, %v3376_v37 }
  0x56   :  { %2827 = vmatpush3.bf16.msra.mxu0 %v3112_v30  ;;  %v697_v30 = vrot.slane %v683_v26, %v3376_v37 }
  0x57   :  { %2849 = vmatpush3.bf16.msra.mxu1 %v3113_v31  ;;  %2828 = vmatprep.subr.bf16.mxu0 %v3114_v32  ;;  %v739_v31 = vrot.slane %v688_v27, %v3376_v37  ;;  %v725_v32 = vrot.slane %v687_v28, %v3376_v37  ;;  %v3202_v28 = vld [vmem:[#allocation5 + $0x470] sm:$0xff]  }
  0x58   :  { %2850 = vmatprep.subr.bf16.mxu1 %v3115_v33  ;;  %v3164_v33 = vld [vmem:[#allocation5 + $0x338] sm:$0xff]  }
  0x59   :  { %v752_v36 = vcombine.high %v711_v29, %v739_v31  ;;  %v747_v38 = vcombine.low %v697_v30, %v725_v32 }
  0x5a   :  { %2829 = vmatpush3.bf16.msra.mxu0 %v3116_v34  ;;  %v3165_v34 = vld [vmem:[#allocation5 + $0x3b8] sm:$0xff]  }
  0x5b   :  { %2851 = vmatpush3.bf16.msra.mxu1 %v3117_v35  ;;  %2830 = vmatprep.subr.bf16.mxu0 %v3118_v39  ;;  %v751_v35 = vcombine.low %v711_v29, %v739_v31  ;;  %v748_v39 = vcombine.high %v697_v30, %v725_v32  ;;  %v3203_v29 = vld [vmem:[#allocation5 + $0x4f0] sm:$0xff]   ;;  %v3206_v32 = vld [vmem:[#allocation5 + $0x468] sm:$0xff]  }
  0x5c   :  { %2852 = vmatprep.subr.bf16.mxu1 %v3119_v40  ;;  %v3166_v40 = vld [vmem:[#allocation5 + $0x370] sm:$0xff]  }
  0x5d   :  { %v3204_v30 = vld [vmem:[#allocation5 + $0x430] sm:$0xff]  }
  0x5e   :  { %2831 = vmatpush3.bf16.msra.mxu0 %v3120_v41  ;;  %v3167_v41 = vld [vmem:[#allocation5 + $0x3f0] sm:$0xff]  }
  0x5f   :  { %2853 = vmatpush3.bf16.msra.mxu1 %v3121_v42  ;;  %2860 = vmatprep.subr.bf16.mxu0 %v3122_v45  ;;  %v3168_v42 = vld [vmem:[#allocation5 + $0x330] sm:$0xff]   ;;  %v3171_v45 = vld [vmem:[#allocation5 + $0x3e8] sm:$0xff]  }
  0x60   :  { %2882 = vmatprep.subr.bf16.mxu1 %v3123_v46  ;;  %v3172_v46 = vld [vmem:[#allocation5 + $0x328] sm:$0xff]   ;;  %v3205_v31 = vld [vmem:[#allocation5 + $0x4b0] sm:$0xff]  }
  0x61   :  { %2182 = vmatmul.mubr.bf16.vlgmr.msra.gmra.mxu0 %v613_v48  ;;  %v3174_v48 = vld [vmem:[#allocation5 + $0x360] sm:$0xff]  }
  0x62   :  { %2223 = vmatmul.mubr.bf16.vlgmr.msra.gmra.mxu1 %v614_v49  ;;  %2861 = vmatpush3.bf16.msra.mxu0 %v3124_v47  ;;  %v3173_v47 = vld [vmem:[#allocation5 + $0x3a8] sm:$0xff]   ;;  %v3175_v49 = vld [vmem:[#allocation5 + $0x3e0] sm:$0xff]  }
  0x63   :  { %2883 = vmatpush3.bf16.msra.mxu1 %v3125_v50  ;;  %2862 = vmatprep.subr.bf16.mxu0 %v3126_v51  ;;  %v3176_v50 = vld [vmem:[#allocation5 + $0x320] sm:$0xff]  }
  0x64   :  { %2884 = vmatprep.subr.bf16.mxu1 %v3127_v52  ;;  %2263 = vmatprep.mubr.bf16.mxu0 %v751_v35  ;;  %v3177_v51 = vld [vmem:[#allocation5 + $0x3a0] sm:$0xff]   ;;  %v3178_v52 = vld [vmem:[#allocation5 + $0x358] sm:$0xff]   ;;  %v3209_v35 = vld [vmem:[#allocation5 + $0x4a8] sm:$0xff]  }
  0x65   :  { %2304 = vmatprep.mubr.bf16.mxu1 %v752_v36  ;;  %v3210_v36 = vld [vmem:[#allocation5 + $0x460] sm:$0xff]  }
  0x66   :  { %2863 = vmatpush3.bf16.msra.mxu0 %v3128_v53  ;;  %v3179_v53 = vld [vmem:[#allocation5 + $0x3d8] sm:$0xff]  }
  0x67   :  { %2885 = vmatpush3.bf16.msra.mxu1 %v3129_v54  ;;  %2864 = vmatprep.subr.bf16.mxu0 %v3130_v55  ;;  %v3180_v54 = vld [vmem:[#allocation5 + $0x318] sm:$0xff]  }
  0x68   :  { %2886 = vmatprep.subr.bf16.mxu1 %v3131_v56  ;;  %v3181_v55 = vld [vmem:[#allocation5 + $0x398] sm:$0xff]   ;;  %v3182_v56 = vld [vmem:[#allocation5 + $0x350] sm:$0xff]  }
  0x6a   :  { %2865 = vmatpush3.bf16.msra.mxu0 %v3132_v57  ;;  %v3183_v57 = vld [vmem:[#allocation5 + $0x3d0] sm:$0xff]  }
  0x6b   :  { %2887 = vmatpush3.bf16.msra.mxu1 %v3133_v58  ;;  %2866 = vmatprep.subr.bf16.mxu0 %v3134_v59  ;;  %v3184_v58 = vld [vmem:[#allocation5 + $0x310] sm:$0xff]  }
  0x6c   :  { %2888 = vmatprep.subr.bf16.mxu1 %v3135_v60  ;;  %v3185_v59 = vld [vmem:[#allocation5 + $0x390] sm:$0xff]   ;;  %v3186_v60 = vld [vmem:[#allocation5 + $0x348] sm:$0xff]  }
  0x6e   :  { %2867 = vmatpush3.bf16.msra.mxu0 %v3136_v61  ;;  %v3187_v61 = vld [vmem:[#allocation5 + $0x3c8] sm:$0xff]  }
  0x6f   :  { %2889 = vmatpush3.bf16.msra.mxu1 %v3137_v62  ;;  %2868 = vmatprep.subr.bf16.mxu0 %v3138_v63  ;;  %v3188_v62 = vld [vmem:[#allocation5 + $0x308] sm:$0xff]  }
  0x70   :  { %2890 = vmatprep.subr.bf16.mxu1 %v3139_v0  ;;  %v3189_v63 = vld [vmem:[#allocation5 + $0x388] sm:$0xff]   ;;  %v3190_v0 = vld [vmem:[#allocation5 + $0x340] sm:$0xff]  }
  0x72   :  { %2869 = vmatpush3.bf16.msra.mxu0 %v3140_v1  ;;  %v3191_v1 = vld [vmem:[#allocation5 + $0x3c0] sm:$0xff]  }
  0x73   :  { %2891 = vmatpush3.bf16.msra.mxu1 %v3141_v2  ;;  %2870 = vmatprep.subr.bf16.mxu0 %v3142_v3  ;;  %v3194_v2 = vld [vmem:[#allocation2 + $0xc] ss:$24 sps:$4 sm:$0xff]   ;;  %v3195_v3 = vld [vmem:[#allocation2 + $0x3c] ss:$24 sps:$4 sm:$0xff]  }
  0x74   :  { %2892 = vmatprep.subr.bf16.mxu1 %v3143_v4  ;;  %v3196_v4 = vld [vmem:[#allocation2 + $0x6c] ss:$24 sps:$4 sm:$0xff]  }
  0x76   :  { %2871 = vmatpush3.bf16.msra.mxu0 %v3144_v5  ;;  %v3197_v5 = vld [vmem:[#allocation2 + $0x9c] ss:$24 sps:$4 sm:$0xff]  }
  0x77   :  { %2893 = vmatpush3.bf16.msra.mxu1 %v3145_v6  ;;  %2872 = vmatprep.subr.bf16.mxu0 %v3146_v7  ;;  %v640_v6 = vrot.slane %v3194_v2, %v3376_v37  ;;  %v654_v7 = vrot.slane %v3195_v3, %v3376_v37  ;;  %v3239_v2 = vld [vmem:[#allocation5 + $0x5f8] sm:$0xff]  }
  0x78   :  { %2894 = vmatprep.subr.bf16.mxu1 %v3147_v8  ;;  %v3192_v8 = vld [vmem:[#allocation5 + $0x300] sm:$0xff]  }
  0x7a   :  { %2873 = vmatpush3.bf16.msra.mxu0 %v3148_v9  ;;  %v668_v9 = vrot.slane %v3196_v4, %v3376_v37 }
  0x7b   :  { %2895 = vmatpush3.bf16.msra.mxu1 %v3149_v10  ;;  %2874 = vmatprep.subr.bf16.mxu0 %v3150_v11  ;;  %v682_v10 = vrot.slane %v3197_v5, %v3376_v37  ;;  %v3193_v11 = vld [vmem:[#allocation5 + $0x380] sm:$0xff]  }
  0x7c   :  { %2896 = vmatprep.subr.bf16.mxu1 %v3151_v12  ;;  %v686_v12 = vcombine.high %v640_v6, %v654_v7 }
  0x7d   :  { %v689_v15 = vcombine.low %v668_v9, %v682_v10 }
  0x7e   :  { %2875 = vmatpush3.bf16.msra.mxu0 %v3152_v13  ;;  %v685_v13 = vcombine.low %v640_v6, %v654_v7  ;;  %v718_v17 = vrot.slane %v686_v12, %v3376_v37  ;;  %v3241_v12 = vld [vmem:[#allocation5 + $0x5b8] sm:$0xff]  }
  0x7f   :  { %2897 = vmatpush3.bf16.msra.mxu1 %v3153_v14  ;;  %2904 = vmatprep.subr.bf16.mxu0 %v3162_v22  ;;  %v690_v14 = vcombine.high %v668_v9, %v682_v10  ;;  %v732_v21 = vrot.slane %v689_v15, %v3376_v37  ;;  %v3200_v22 = vld [vmem:[#allocation5 + $0x438] sm:$0xff]  }
  0x80   :  { %2926 = vmatprep.subr.bf16.mxu1 %v3163_v24  ;;  %v704_v18 = vrot.slane %v685_v13, %v3376_v37 }
  0x81   :  { %2264 = vmatmul.mubr.bf16.vlgmr.msra.gmra.mxu0 %v747_v38  ;;  %v746_v20 = vrot.slane %v690_v14, %v3376_v37  ;;  %v3211_v38 = vld [vmem:[#allocation5 + $0x4e0] sm:$0xff]  }
  0x82   :  { %2305 = vmatmul.mubr.bf16.vlgmr.msra.gmra.mxu1 %v748_v39  ;;  %2905 = vmatpush3.bf16.msra.mxu0 %v3164_v33  ;;  %v749_v26 = vcombine.low %v704_v18, %v732_v21  ;;  %v750_v27 = vcombine.high %v704_v18, %v732_v21  ;;  %v3207_v33 = vld [vmem:[#allocation5 + $0x4e8] sm:$0xff]   ;;  %v3212_v39 = vld [vmem:[#allocation5 + $0x420] sm:$0xff]   ;;  %v3243_v18 = vld [vmem:[#allocation5 + $0x5f0] sm:$0xff]  }
  0x83   :  { %2927 = vmatpush3.bf16.msra.mxu1 %v3165_v34  ;;  %2906 = vmatprep.subr.bf16.mxu0 %v3166_v40  ;;  %v753_v24 = vcombine.low %v718_v17, %v746_v20  ;;  %v754_v25 = vcombine.high %v718_v17, %v746_v20  ;;  %v3208_v34 = vld [vmem:[#allocation5 + $0x428] sm:$0xff]   ;;  %v3213_v40 = vld [vmem:[#allocation5 + $0x4a0] sm:$0xff]   ;;  %v3242_v17 = vld [vmem:[#allocation5 + $0x570] sm:$0xff]  }
  0x84   :  { %2928 = vmatprep.subr.bf16.mxu1 %v3167_v41  ;;  %v3214_v41 = vld [vmem:[#allocation5 + $0x458] sm:$0xff]   ;;  %v3245_v20 = vld [vmem:[#allocation5 + $0x5b0] sm:$0xff]   ;;  %v3246_v21 = vld [vmem:[#allocation5 + $0x568] sm:$0xff]  }
  0x85   :  { %2345 = vmatprep.mubr.bf16.mxu0 %v753_v24  ;;  %2386 = vmatprep.mubr.bf16.mxu1 %v754_v25  ;;  %v3249_v24 = vld [vmem:[#allocation5 + $0x5a8] sm:$0xff]   ;;  %v3250_v25 = vld [vmem:[#allocation5 + $0x560] sm:$0xff]  }
  0x86   :  { %2907 = vmatpush3.bf16.msra.mxu0 %v3168_v42  ;;  %v3215_v42 = vld [vmem:[#allocation5 + $0x4d8] sm:$0xff]  }
  0x87   :  { %2929 = vmatpush3.bf16.msra.mxu1 %v3169_v43  ;;  %2908 = vmatprep.subr.bf16.mxu0 %v3170_v44  ;;  %v3216_v43 = vld [vmem:[#allocation5 + $0x418] sm:$0xff]  }
  0x88   :  { %2930 = vmatprep.subr.bf16.mxu1 %v3171_v45  ;;  %v3217_v44 = vld [vmem:[#allocation5 + $0x498] sm:$0xff]   ;;  %v3218_v45 = vld [vmem:[#allocation5 + $0x450] sm:$0xff]  }
  0x8a   :  { %2909 = vmatpush3.bf16.msra.mxu0 %v3172_v46  ;;  %v3219_v46 = vld [vmem:[#allocation5 + $0x4d0] sm:$0xff]  }
  0x8b   :  { %2931 = vmatpush3.bf16.msra.mxu1 %v3173_v47  ;;  %2910 = vmatprep.subr.bf16.mxu0 %v3174_v48  ;;  %v3220_v47 = vld [vmem:[#allocation5 + $0x410] sm:$0xff]  }
  0x8c   :  { %2932 = vmatprep.subr.bf16.mxu1 %v3175_v49  ;;  %v3221_v48 = vld [vmem:[#allocation5 + $0x490] sm:$0xff]   ;;  %v3222_v49 = vld [vmem:[#allocation5 + $0x448] sm:$0xff]  }
  0x8e   :  { %2911 = vmatpush3.bf16.msra.mxu0 %v3176_v50  ;;  %v3223_v50 = vld [vmem:[#allocation5 + $0x4c8] sm:$0xff]  }
  0x8f   :  { %2933 = vmatpush3.bf16.msra.mxu1 %v3177_v51  ;;  %2912 = vmatprep.subr.bf16.mxu0 %v3178_v52  ;;  %v3224_v51 = vld [vmem:[#allocation5 + $0x408] sm:$0xff]  }
  0x90   :  { %2934 = vmatprep.subr.bf16.mxu1 %v3179_v53  ;;  %v3225_v52 = vld [vmem:[#allocation5 + $0x488] sm:$0xff]   ;;  %v3226_v53 = vld [vmem:[#allocation5 + $0x440] sm:$0xff]  }
  0x92   :  { %2913 = vmatpush3.bf16.msra.mxu0 %v3180_v54  ;;  %v3227_v54 = vld [vmem:[#allocation5 + $0x4c0] sm:$0xff]  }
  0x93   :  { %2935 = vmatpush3.bf16.msra.mxu1 %v3181_v55  ;;  %2914 = vmatprep.subr.bf16.mxu0 %v3182_v56  ;;  %v3228_v55 = vld [vmem:[#allocation5 + $0x400] sm:$0xff]  }
  0x94   :  { %2936 = vmatprep.subr.bf16.mxu1 %v3183_v57  ;;  %v3229_v56 = vld [vmem:[#allocation5 + $0x480] sm:$0xff]   ;;  %v3230_v57 = vld [vmem:[#allocation2 + $0x10] ss:$24 sps:$4 sm:$0xff]  }
  0x96   :  { %2915 = vmatpush3.bf16.msra.mxu0 %v3184_v58  ;;  %v3232_v58 = vld [vmem:[#allocation2 + $0x40] ss:$24 sps:$4 sm:$0xff]  }
  0x97   :  { %2937 = vmatpush3.bf16.msra.mxu1 %v3185_v59  ;;  %2916 = vmatprep.subr.bf16.mxu0 %v3186_v60  ;;  %v3234_v59 = vld [vmem:[#allocation2 + $0x70] ss:$24 sps:$4 sm:$0xff]   ;;  %v3236_v60 = vld [vmem:[#allocation2 + $0xa0] ss:$24 sps:$4 sm:$0xff]  }
  0x98   :  { %2938 = vmatprep.subr.bf16.mxu1 %v3187_v61  ;;  %v769_v61 = vrot.slane %v3230_v57, %v3376_v37 }
  0x9a   :  { %2917 = vmatpush3.bf16.msra.mxu0 %v3188_v62  ;;  %v783_v62 = vrot.slane %v3232_v58, %v3376_v37 }
  0x9b   :  { %2939 = vmatpush3.bf16.msra.mxu1 %v3189_v63  ;;  %2918 = vmatprep.subr.bf16.mxu0 %v3190_v0  ;;  %v3238_v63 = vld [vmem:[#allocation5 + $0x578] sm:$0xff]   ;;  %v797_v0 = vrot.slane %v3234_v59, %v3376_v37 }
  0x9c   :  { %2940 = vmatprep.subr.bf16.mxu1 %v3191_v1  ;;  %v811_v1 = vrot.slane %v3236_v60, %v3376_v37  ;;  %v820_v3 = vcombine.high %v769_v61, %v783_v62  ;;  %v819_v4 = vcombine.low %v769_v61, %v783_v62 }
  0x9e   :  { %2919 = vmatpush3.bf16.msra.mxu0 %v3192_v8  ;;  %v824_v5 = vcombine.high %v797_v0, %v811_v1  ;;  %v823_v6 = vcombine.low %v797_v0, %v811_v1  ;;  %v847_v7 = vrot.slane %v820_v3, %v3376_v37  ;;  %v833_v8 = vrot.slane %v819_v4, %v3376_v37 }
  0x9f   :  { %2941 = vmatpush3.bf16.msra.mxu1 %v3193_v11  ;;  %2948 = vmatprep.subr.bf16.mxu0 %v3198_v16  ;;  %v3240_v11 = vld [vmem:[#allocation5 + $0x538] sm:$0xff]  }
  0xa0   :  { %2970 = vmatprep.subr.bf16.mxu1 %v3199_v19  ;;  %v875_v9 = vrot.slane %v824_v5, %v3376_v37  ;;  %v861_v10 = vrot.slane %v823_v6, %v3376_v37  ;;  %v3244_v19 = vld [vmem:[#allocation5 + $0x530] sm:$0xff]  }
  0xa1   :  { %2346 = vmatmul.mubr.bf16.vlgmr.msra.gmra.mxu0 %v749_v26  ;;  %v3251_v26 = vld [vmem:[#allocation5 + $0x5e0] sm:$0xff]  }
  0xa2   :  { %2387 = vmatmul.mubr.bf16.vlgmr.msra.gmra.mxu1 %v750_v27  ;;  %2949 = vmatpush3.bf16.msra.mxu0 %v3200_v22  ;;  %v887_v13 = vcombine.low %v847_v7, %v875_v9  ;;  %v888_v14 = vcombine.high %v847_v7, %v875_v9  ;;  %v883_v15 = vcombine.low %v833_v8, %v861_v10  ;;  %v3247_v22 = vld [vmem:[#allocation5 + $0x5e8] sm:$0xff]   ;;  %v3252_v27 = vld [vmem:[#allocation5 + $0x520] sm:$0xff]  }
  0xa3   :  { %2971 = vmatpush3.bf16.msra.mxu1 %v3201_v23  ;;  %2950 = vmatprep.subr.bf16.mxu0 %v3202_v28  ;;  %v884_v16 = vcombine.high %v833_v8, %v861_v10  ;;  %v3248_v23 = vld [vmem:[#allocation5 + $0x528] sm:$0xff]   ;;  %v3253_v28 = vld [vmem:[#allocation5 + $0x5a0] sm:$0xff]  }
  0xa4   :  { %2972 = vmatprep.subr.bf16.mxu1 %v3203_v29  ;;  %2427 = vmatprep.mubr.bf16.mxu0 %v887_v13  ;;  %v3254_v29 = vld [vmem:[#allocation5 + $0x558] sm:$0xff]  }
  0xa5   :  { %2468 = vmatprep.mubr.bf16.mxu1 %v888_v14 }
  0xa6   :  { %2951 = vmatpush3.bf16.msra.mxu0 %v3204_v30  ;;  %v3255_v30 = vld [vmem:[#allocation5 + $0x5d8] sm:$0xff]  }
  0xa7   :  { %2973 = vmatpush3.bf16.msra.mxu1 %v3205_v31  ;;  %2952 = vmatprep.subr.bf16.mxu0 %v3206_v32  ;;  %v3256_v31 = vld [vmem:[#allocation5 + $0x518] sm:$0xff]  }
  0xa8   :  { %2974 = vmatprep.subr.bf16.mxu1 %v3207_v33  ;;  %v3257_v32 = vld [vmem:[#allocation5 + $0x598] sm:$0xff]   ;;  %v3258_v33 = vld [vmem:[#allocation5 + $0x550] sm:$0xff]  }
  0xaa   :  { %2953 = vmatpush3.bf16.msra.mxu0 %v3208_v34  ;;  %v3259_v34 = vld [vmem:[#allocation5 + $0x5d0] sm:$0xff]  }
  0xab   :  { %2975 = vmatpush3.bf16.msra.mxu1 %v3209_v35  ;;  %2954 = vmatprep.subr.bf16.mxu0 %v3210_v36  ;;  %v3260_v35 = vld [vmem:[#allocation5 + $0x510] sm:$0xff]  }
  0xac   :  { %2976 = vmatprep.subr.bf16.mxu1 %v3211_v38  ;;  %v3261_v36 = vld [vmem:[#allocation5 + $0x590] sm:$0xff]   ;;  %v3262_v38 = vld [vmem:[#allocation5 + $0x548] sm:$0xff]  }
  0xae   :  { %2955 = vmatpush3.bf16.msra.mxu0 %v3212_v39  ;;  %v3263_v39 = vld [vmem:[#allocation5 + $0x5c8] sm:$0xff]  }
  0xaf   :  { %2977 = vmatpush3.bf16.msra.mxu1 %v3213_v40  ;;  %2956 = vmatprep.subr.bf16.mxu0 %v3214_v41  ;;  %v3264_v40 = vld [vmem:[#allocation5 + $0x508] sm:$0xff]  }
  0xb0   :  { %2978 = vmatprep.subr.bf16.mxu1 %v3215_v42  ;;  %v3265_v41 = vld [vmem:[#allocation5 + $0x588] sm:$0xff]   ;;  %v3266_v42 = vld [vmem:[#allocation5 + $0x540] sm:$0xff]  }
  0xb2   :  { %2957 = vmatpush3.bf16.msra.mxu0 %v3216_v43  ;;  %v3267_v43 = vld [vmem:[#allocation5 + $0x5c0] sm:$0xff]  }
  0xb3   :  { %2979 = vmatpush3.bf16.msra.mxu1 %v3217_v44  ;;  %2958 = vmatprep.subr.bf16.mxu0 %v3218_v45  ;;  %v3270_v44 = vld [vmem:[#allocation2 + $0x14] ss:$24 sps:$4 sm:$0xff]   ;;  %v3271_v45 = vld [vmem:[#allocation2 + $0x44] ss:$24 sps:$4 sm:$0xff]  }
  0xb4   :  { %2980 = vmatprep.subr.bf16.mxu1 %v3219_v46  ;;  %v3272_v46 = vld [vmem:[#allocation2 + $0x74] ss:$24 sps:$4 sm:$0xff]  }
  0xb6   :  { %2959 = vmatpush3.bf16.msra.mxu0 %v3220_v47  ;;  %v3273_v47 = vld [vmem:[#allocation2 + $0xa4] ss:$24 sps:$4 sm:$0xff]  }
  0xb7   :  { %2981 = vmatpush3.bf16.msra.mxu1 %v3221_v48  ;;  %2960 = vmatprep.subr.bf16.mxu0 %v3222_v49  ;;  %v776_v48 = vrot.slane %v3270_v44, %v3376_v37  ;;  %v790_v49 = vrot.slane %v3271_v45, %v3376_v37 }
  0xb8   :  { %2982 = vmatprep.subr.bf16.mxu1 %v3223_v50  ;;  %v804_v50 = vrot.slane %v3272_v46, %v3376_v37 }
  0xba   :  { %2961 = vmatpush3.bf16.msra.mxu0 %v3224_v51  ;;  %v818_v51 = vrot.slane %v3273_v47, %v3376_v37 }
  0xbb   :  { %2983 = vmatpush3.bf16.msra.mxu1 %v3225_v52  ;;  %2962 = vmatprep.subr.bf16.mxu0 %v3226_v53  ;;  %v3268_v52 = vld [vmem:[#allocation5 + $0x500] sm:$0xff]  }
  0xbc   :  { %2984 = vmatprep.subr.bf16.mxu1 %v3227_v54  ;;  %v3269_v53 = vld [vmem:[#allocation5 + $0x580] sm:$0xff]   ;;  %v822_v54 = vcombine.high %v776_v48, %v790_v49  ;;  %v825_v57 = vcombine.low %v804_v50, %v818_v51 }
  0xbe   :  { %2963 = vmatpush3.bf16.msra.mxu0 %v3228_v55  ;;  %v826_v55 = vcombine.high %v804_v50, %v818_v51  ;;  %v854_v58 = vrot.slane %v822_v54, %v3376_v37  ;;  %v868_v61 = vrot.slane %v825_v57, %v3376_v37 }
  0xbf   :  { %2985 = vmatpush3.bf16.msra.mxu1 %v3229_v56  ;;  %2992 = vmatprep.subr.bf16.mxu0 %v3238_v63  ;;  %v821_v56 = vcombine.low %v776_v48, %v790_v49 }
  0xc0   :  { %3014 = vmatprep.subr.bf16.mxu1 %v3239_v2  ;;  %v882_v59 = vrot.slane %v826_v55, %v3376_v37 }
  0xc1   :  { %2428 = vmatmul.mubr.bf16.vlgmr.msra.gmra.mxu0 %v883_v15  ;;  %v840_v60 = vrot.slane %v821_v56, %v3376_v37 }
  0xc2   :  { %2469 = vmatmul.mubr.bf16.vlgmr.msra.gmra.mxu1 %v884_v16  ;;  %2993 = vmatpush3.bf16.msra.mxu0 %v3240_v11  ;;  %v889_v62 = vcombine.low %v854_v58, %v882_v59  ;;  %v890_v63 = vcombine.high %v854_v58, %v882_v59 }
  0xc3   :  { %3015 = vmatpush3.bf16.msra.mxu1 %v3241_v12  ;;  %2994 = vmatprep.subr.bf16.mxu0 %v3242_v17  ;;  %v885_v0 = vcombine.low %v840_v60, %v868_v61  ;;  %v886_v1 = vcombine.high %v840_v60, %v868_v61 }
  0xc4   :  { %3016 = vmatprep.subr.bf16.mxu1 %v3243_v18  ;;  %2509 = vmatprep.mubr.bf16.mxu0 %v889_v62 }
  0xc5   :  { %2550 = vmatprep.mubr.bf16.mxu1 %v890_v63 }
  0xc6   :  { %2995 = vmatpush3.bf16.msra.mxu0 %v3244_v19 }
  0xc7   :  { %3017 = vmatpush3.bf16.msra.mxu1 %v3245_v20  ;;  %2996 = vmatprep.subr.bf16.mxu0 %v3246_v21 }
  0xc8   :  { %3018 = vmatprep.subr.bf16.mxu1 %v3247_v22 }
  0xca   :  { %2997 = vmatpush3.bf16.msra.mxu0 %v3248_v23 }
  0xcb   :  { %3019 = vmatpush3.bf16.msra.mxu1 %v3249_v24  ;;  %2998 = vmatprep.subr.bf16.mxu0 %v3250_v25 }
  0xcc   :  { %3020 = vmatprep.subr.bf16.mxu1 %v3251_v26 }
  0xce   :  { %2999 = vmatpush3.bf16.msra.mxu0 %v3252_v27  ;;  %v2579_v27 = vld [vmem:[%s3450_s2] ss:$0 sm:$0xff] }
  0xcf   :  { %3021 = vmatpush3.bf16.msra.mxu1 %v3253_v28  ;;  %3000 = vmatprep.subr.bf16.mxu0 %v3254_v29 }
  0xd0   :  { %3022 = vmatprep.subr.bf16.mxu1 %v3255_v30 }
  0xd2   :  { %3001 = vmatpush3.bf16.msra.mxu0 %v3256_v31 }
  0xd3   :  { %3023 = vmatpush3.bf16.msra.mxu1 %v3257_v32  ;;  %3002 = vmatprep.subr.bf16.mxu0 %v3258_v33 }
  0xd4   :  { %3024 = vmatprep.subr.bf16.mxu1 %v3259_v34 }
  0xd6   :  { %3003 = vmatpush3.bf16.msra.mxu0 %v3260_v35 }
  0xd7   :  { %3025 = vmatpush3.bf16.msra.mxu1 %v3261_v36  ;;  %3004 = vmatprep.subr.bf16.mxu0 %v3262_v38 }
  0xd8   :  { %3026 = vmatprep.subr.bf16.mxu1 %v3263_v39 }
  0xda   :  { %3005 = vmatpush3.bf16.msra.mxu0 %v3264_v40 }
  0xdb   :  { %3027 = vmatpush3.bf16.msra.mxu1 %v3265_v41  ;;  %3006 = vmatprep.subr.bf16.mxu0 %v3266_v42 }
  0xdc   :  { %3028 = vmatprep.subr.bf16.mxu1 %v3267_v43 }
  0xde   :  { %3007 = vmatpush3.bf16.msra.mxu0 %v3268_v52 }
  0xdf   :  { %3029 = vmatpush3.bf16.msra.mxu1 %v3269_v53 }
  0xe1   :  { %2510 = vmatmul.mubr.bf16.vlgmr.msra.gmra.mxu0 %v885_v0 }
  0xe2   :  { %2551 = vmatmul.mubr.bf16.vlgmr.msra.gmra.mxu1 %v886_v1 }
 0x101   :  { %v2788_v2 = vpop.f32.mrf.mxu0 }
 0x102   :  { %v2810_v3 = vpop.f32.mrf.mxu1 }
 0x103   :  { %v2789_v4 = vpop.f32.mrf.mxu0 }
 0x104   :  { %v2811_v5 = vpop.f32.mrf.mxu1  ;;  %v2790_v26 = vadd.f32 %v2789_v4, %v2788_v2 }
 0x105   :  { %v2791_v6 = vpop.f32.mrf.mxu0  ;;  %v2812_v31 = vadd.f32 %v2811_v5, %v2810_v3 }
 0x106   :  { %v2813_v7 = vpop.f32.mrf.mxu1  ;;  %v2102_v30 = vadd.f32 %v2790_v26, %v2579_v27 }
 0x107   :  { %v2792_v8 = vpop.f32.mrf.mxu0 }
 0x108   :  { %v2814_v9 = vpop.f32.mrf.mxu1  ;;  %v2793_v32 = vadd.f32 %v2792_v8, %v2791_v6  ;;  %v2143_v36 = vadd.f32 %v2812_v31, %v2102_v30 }
 0x109   :  { %v2815_v40 = vadd.f32 %v2814_v9, %v2813_v7 }
 0x10a   :  { %v2105_v38 = vadd.f32 %v2793_v32, %v2579_v27 }
 0x10c   :  { %v2146_v45 = vadd.f32 %v2815_v40, %v2105_v38 }
 0x121   :  { %v2832_v10 = vpop.f32.mrf.mxu0 }
 0x122   :  { %v2854_v11 = vpop.f32.mrf.mxu1 }
 0x123   :  { %v2833_v12 = vpop.f32.mrf.mxu0 }
 0x124   :  { %v2855_v37 = vpop.f32.mrf.mxu1  ;;  %v2834_v34 = vadd.f32 %v2833_v12, %v2832_v10 }
 0x125   :  { %v2835_v13 = vpop.f32.mrf.mxu0  ;;  %v2856_v42 = vadd.f32 %v2855_v37, %v2854_v11 }
 0x126   :  { %v2857_v14 = vpop.f32.mrf.mxu1  ;;  %v2184_v41 = vadd.f32 %v2834_v34, %v2143_v36 }
 0x127   :  { %v2836_v15 = vpop.f32.mrf.mxu0 }
 0x128   :  { %v2858_v16 = vpop.f32.mrf.mxu1  ;;  %v2837_v43 = vadd.f32 %v2836_v15, %v2835_v13  ;;  %v2225_v49 = vadd.f32 %v2856_v42, %v2184_v41 }
 0x129   :  { %v2859_v52 = vadd.f32 %v2858_v16, %v2857_v14 }
 0x12a   :  { %v2187_v50 = vadd.f32 %v2837_v43, %v2146_v45 }
 0x12c   :  { %v2228_v57 = vadd.f32 %v2859_v52, %v2187_v50 }
 0x141   :  { %v2876_v17 = vpop.f32.mrf.mxu0 }
 0x142   :  { %v2898_v18 = vpop.f32.mrf.mxu1 }
 0x143   :  { %v2877_v19 = vpop.f32.mrf.mxu0 }
 0x144   :  { %v2899_v20 = vpop.f32.mrf.mxu1  ;;  %v2878_v46 = vadd.f32 %v2877_v19, %v2876_v17 }
 0x145   :  { %v2879_v21 = vpop.f32.mrf.mxu0  ;;  %v2900_v54 = vadd.f32 %v2899_v20, %v2898_v18 }
 0x146   :  { %v2901_v22 = vpop.f32.mrf.mxu1  ;;  %v2266_v53 = vadd.f32 %v2878_v46, %v2225_v49 }
 0x147   :  { %v2880_v23 = vpop.f32.mrf.mxu0 }
 0x148   :  { %v2902_v24 = vpop.f32.mrf.mxu1  ;;  %v2881_v55 = vadd.f32 %v2880_v23, %v2879_v21  ;;  %v2307_v60 = vadd.f32 %v2900_v54, %v2266_v53 }
 0x149   :  { %v2903_v63 = vadd.f32 %v2902_v24, %v2901_v22 }
 0x14a   :  { %v2269_v61 = vadd.f32 %v2881_v55, %v2228_v57 }
 0x14c   :  { %v2310_v4 = vadd.f32 %v2903_v63, %v2269_v61 }
 0x161   :  { %v2920_v25 = vpop.f32.mrf.mxu0 }
 0x162   :  { %v2942_v28 = vpop.f32.mrf.mxu1 }
 0x163   :  { %v2921_v29 = vpop.f32.mrf.mxu0 }
 0x164   :  { %v2943_v33 = vpop.f32.mrf.mxu1  ;;  %v2922_v58 = vadd.f32 %v2921_v29, %v2920_v25 }
 0x165   :  { %v2923_v35 = vpop.f32.mrf.mxu0  ;;  %v2944_v1 = vadd.f32 %v2943_v33, %v2942_v28 }
 0x166   :  { %v2945_v39 = vpop.f32.mrf.mxu1  ;;  %v2348_v0 = vadd.f32 %v2922_v58, %v2307_v60 }
 0x167   :  { %v2924_v44 = vpop.f32.mrf.mxu0 }
 0x168   :  { %v2946_v47 = vpop.f32.mrf.mxu1  ;;  %v2925_v2 = vadd.f32 %v2924_v44, %v2923_v35  ;;  %v2389_v7 = vadd.f32 %v2944_v1, %v2348_v0 }
 0x169   :  { %v2947_v10 = vadd.f32 %v2946_v47, %v2945_v39 }
 0x16a   :  { %v2351_v8 = vadd.f32 %v2925_v2, %v2310_v4 }
 0x16c   :  { %v2392_v15 = vadd.f32 %v2947_v10, %v2351_v8 }
 0x181   :  { %v2964_v48 = vpop.f32.mrf.mxu0 }
 0x182   :  { %v2986_v51 = vpop.f32.mrf.mxu1 }
 0x183   :  { %v2965_v56 = vpop.f32.mrf.mxu0 }
 0x184   :  { %v2987_v59 = vpop.f32.mrf.mxu1  ;;  %v2966_v5 = vadd.f32 %v2965_v56, %v2964_v48 }
 0x185   :  { %v2967_v62 = vpop.f32.mrf.mxu0  ;;  %v2988_v12 = vadd.f32 %v2987_v59, %v2986_v51 }
 0x186   :  { %v2989_v3 = vpop.f32.mrf.mxu1  ;;  %v2430_v11 = vadd.f32 %v2966_v5, %v2389_v7 }
 0x187   :  { %v2968_v6 = vpop.f32.mrf.mxu0 }
 0x188   :  { %v2990_v9 = vpop.f32.mrf.mxu1  ;;  %v2969_v37 = vadd.f32 %v2968_v6, %v2967_v62  ;;  %v2471_v18 = vadd.f32 %v2988_v12, %v2430_v11 }
 0x189   :  { %v2991_v23 = vadd.f32 %v2990_v9, %v2989_v3 }
 0x18a   :  { %v2433_v19 = vadd.f32 %v2969_v37, %v2392_v15 }
 0x18c   :  { %v2474_v28 = vadd.f32 %v2991_v23, %v2433_v19 }
 0x1a1   :  { %v3008_v13 = vpop.f32.mrf.mxu0 }
 0x1a2   :  { %v3030_v14 = vpop.f32.mrf.mxu1 }
 0x1a3   :  { %v3009_v16 = vpop.f32.mrf.mxu0 }
 0x1a4   :  { %v3031_v17 = vpop.f32.mrf.mxu1  ;;  %v3010_v20 = vadd.f32 %v3009_v16, %v3008_v13 }
 0x1a5   :  { %v3011_v21 = vpop.f32.mrf.mxu0  ;;  %v3032_v25 = vadd.f32 %v3031_v17, %v3030_v14 }
 0x1a6   :  { %v3033_v22 = vpop.f32.mrf.mxu1  ;;  %v2512_v24 = vadd.f32 %v3010_v20, %v2471_v18 }
 0x1a7   :  { %v3012_v26 = vpop.f32.mrf.mxu0 }
 0x1a8   :  { %v3034_v27 = vpop.f32.mrf.mxu1  ;;  %v2553_v29 = vadd.f32 %v3032_v25, %v2512_v24  ;;  %v3013_v30 = vadd.f32 %v3012_v26, %v3011_v21 }
 0x1a9   :  { %v3035_v32 = vadd.f32 %v3034_v27, %v3033_v22 }
 0x1aa   :  { %2559 = vst [vmem:[#allocation7] sm:$0xff] %v2553_v29  ;;  %v2515_v31 = vadd.f32 %v3013_v30, %v2474_v28 }
 0x1ac   :  { %v2556_v33 = vadd.f32 %v3035_v32, %v2515_v31 }
 0x1ae   :  { %2560 = vst [vmem:[#allocation7 + $0x8] sm:$0xff] %v2556_v33 }
 0x1af   :  { %2565 = vsyncadd [#allocation4], 224  ;;  %s3347_s2 = smov [#allocation7]  }
 0x1b0   :  { %s2566_s27 = sshll.u32 %s3347_s2, 4  ;;  %s2567_s27 = int_to_ptr.vmem [resolvable:$true] %s2566_s27 }
 0x1b1   :  { %s3314_s28 = scalar_lea.vmem %s2567_s27, 32  ;;  %s3318_s29 = scalar_lea.vmem %s2567_s27, 256 }
 0x1b2   :  { %p3315_p10 = scmp.ne.s32.totalorder %s2567_s27, %s3314_s28  ;;  %p3319_p11 = scmp.lt.s32.totalorder %s2567_s27, %s2567_s27 }
 0x1b3   :  { %p3320_p12 = scmp.lt.s32.totalorder %s3318_s29, %s3314_s28 }
 0x1b5   :  { %p3321_p13 = por %p3320_p12, %p3319_p11 }
 0x1b7   :  { %p3322_p0 = pnand %p3321_p13, %p3315_p10 }
 0x1b9   :  { %3325 = shalt.err (!%p3322_p0)
}
 0x1ba   :  { %s3348_s30 = smov 32   ;;  %s3349_s4 = smov 2  }
 0x1bb   :  { %2572 = dma.vmem_to_hbm [thread:$0]  %s2567_s27, 32, %s3451_s3, [#allocation4], %s3348_s30, %s3348_s30, %s3349_s4  }
 0x1bc   :  { %3338 = dma.done.wait [#allocation4], 256  }
 0x1bd   :  { %3339 = vsyncadd [#allocation4], 4294967040 }
 0x1be   :  { %2576 = vsyncpa [#allocation3], 1 }
 0x1bf   :  { %2577 = vsyncpa [#allocation6], 1 }
 0x1c0   :  { %2578 = vsyncpa [#allocation4], 1 }

</bundles_post_ra>
